<compile_context>
chip_gen: v6e
topology: v6e:2x2x1
jax: 0.10.0
libtpu: 0.0.40
codegen_flags: <defaults>
</compile_context>

<pallas_src>
import math

import jax
import jax.numpy as jnp
from jax.experimental import pallas as pl
from jax.experimental.pallas import tpu as pltpu


# ----------------------------------------------------------------------------
# Kernels
# ----------------------------------------------------------------------------
def _noisy_linear_kernel_acc(x_ref, wmu_ref, wsig_ref, eps_in_ref, b_ref,
                             o_ref, acc_ref):
    """K-tiled variant: f32 VMEM accumulator, init at k==0, store at k==last."""
    k = pl.program_id(2)

    @pl.when(k == 0)
    def _init():
        acc_ref[...] = jnp.zeros_like(acc_ref)

    # eps_out is already folded into wsig at prepare time; only the (tk, 1)
    # eps_in lane-broadcast FMA remains on the VPU.
    w_eff = wmu_ref[...] + wsig_ref[...] * eps_in_ref[...]
    acc_ref[...] += jnp.dot(x_ref[...], w_eff,
                            preferred_element_type=jnp.float32)

    @pl.when(k == pl.num_programs(2) - 1)
    def _finalize():
        o_ref[...] = (acc_ref[...] + b_ref[...]).astype(o_ref.dtype)


def _noisy_linear_kernel_single_k(x_ref, wmu_ref, wsig_ref, eps_in_ref, b_ref,
                                  o_ref):
    """Kp//tk == 1 variant: no scratch, no init/finalize phases."""
    w_eff = wmu_ref[...] + wsig_ref[...] * eps_in_ref[...]
    o_ref[...] = (jnp.dot(x_ref[...], w_eff,
                          preferred_element_type=jnp.float32)
                  + b_ref[...]).astype(o_ref.dtype)


# ----------------------------------------------------------------------------
# Init-time preprocessing (once per reset_noise() / parameter update)
# ----------------------------------------------------------------------------
def _round_up(x, m):
    return ((x + m - 1) // m) * m


def _pad2(a, r, c):
    return jnp.pad(a, ((0, r - a.shape[0]), (0, c - a.shape[1])))


def _pad1(a, n):
    return jnp.pad(a, (0, n - a.shape[0]))


def prepare_noisy_linear(weight_mu, weight_sigma, bias_mu, bias_sigma,
                         eps_in, eps_out, *, tn=512, tk=1024,
                         compute_dtype=jnp.bfloat16):
    """One-time layout/noise preprocessing (NOT per forward).

    weight_*: [out, in] (PyTorch parameter layout)
    bias_*  : [out]
    eps_in  : [in]   (weight_epsilon = outer(eps_out, eps_in))
    eps_out : [out]  (bias_epsilon = eps_out)
    """
    N, K = weight_mu.shape
    tn = min(tn, _round_up(N, 128))
    tk = min(tk, _round_up(K, 128))
    Np = _round_up(N, tn)
    Kp = _round_up(K, tk)

    # [out, in] -> [in, out] once; fold eps_out into sigma's columns in f32,
    # then pad and cast the two big streams to the streaming/compute dtype.
    wmu_t = weight_mu.T
    wsig_scaled_t = weight_sigma.T * eps_out[None, :]

    wmu_p = _pad2(wmu_t, Kp, Np).astype(compute_dtype)
    wsig_p = _pad2(wsig_scaled_t, Kp, Np).astype(compute_dtype)
    eps_in_p = _pad1(eps_in, Kp).reshape(Kp, 1).astype(compute_dtype)
    # Fused bias stays f32: it is added straight into the f32 accumulator.
    b_p = _pad1(bias_mu + bias_sigma * eps_out, Np).reshape(1, Np)
    b_p = b_p.astype(jnp.float32)

    return dict(wmu=wmu_p, wsig=wsig_p, eps_in=eps_in_p, bias=b_p,
                N=N, K=K, Np=Np, Kp=Kp, tn=tn, tk=tk,
                compute_dtype=compute_dtype)


# ----------------------------------------------------------------------------
# Per-call forward
# ----------------------------------------------------------------------------
def noisy_linear_apply(x, prep, *, tm=128):
    """Training-mode NoisyLinear forward using prepared streams. x: [B, in]."""
    B, K = x.shape
    assert K == prep["K"], "in_features mismatch"
    N, Np, Kp = prep["N"], prep["Np"], prep["Kp"]
    tn, tk = prep["tn"], prep["tk"]
    compute_dtype = prep["compute_dtype"]
    out_dtype = x.dtype

    tm = min(tm, _round_up(B, 8))
    Mp = _round_up(B, tm)
    x_p = _pad2(x, Mp, Kp).astype(compute_dtype)

    n_blocks, m_blocks, k_blocks = Np // tn, Mp // tm, Kp // tk
    grid = (n_blocks, m_blocks, k_blocks)      # N leading -> megacore splits N
    multi_k = k_blocks > 1

    kernel = _noisy_linear_kernel_acc if multi_k else _noisy_linear_kernel_single_k
    scratch_shapes = [pltpu.VMEM((tm, tn), jnp.float32)] if multi_k else []

    # Explicit scoped-VMEM limit from the real double-buffered footprint so
    # the same tile config compiles on v5e (16 MiB default) and v7x (64 MiB).
    cbytes = jnp.dtype(compute_dtype).itemsize
    obytes = jnp.dtype(out_dtype).itemsize
    footprint = 2 * (tm * tk * cbytes            # x
                     + 2 * tk * tn * cbytes      # W_mu^T + (W_sigma^T*eps_out)
                     + tk * 128 * cbytes         # eps_in (lane-padded)
                     + 8 * tn * 4                # fused bias (sublane-padded)
                     + tm * tn * obytes)         # output
    footprint += tm * tn * 4 if multi_k else 0   # accumulator scratch
    vmem_limit = int(min(max(footprint + (4 << 20), 16 << 20), 32 << 20))

    out = pl.pallas_call(
        kernel,
        out_shape=jax.ShapeDtypeStruct((Mp, Np), out_dtype),
        grid_spec=pltpu.PrefetchScalarGridSpec(
            num_scalar_prefetch=0,
            grid=grid,
            in_specs=[
                pl.BlockSpec((tm, tk), lambda j, i, k: (i, k)),   # x
                pl.BlockSpec((tk, tn), lambda j, i, k: (k, j)),   # W_mu^T
                pl.BlockSpec((tk, tn), lambda j, i, k: (k, j)),   # W_sigma^T*eps_out
                pl.BlockSpec((tk, 1), lambda j, i, k: (k, 0)),    # eps_in
                pl.BlockSpec((1, tn), lambda j, i, k: (0, j)),    # fused bias
            ],
            out_specs=pl.BlockSpec((tm, tn), lambda j, i, k: (i, j)),
            scratch_shapes=scratch_shapes,
        ),
        compiler_params=pltpu.CompilerParams(
            dimension_semantics=("parallel", "parallel", "arbitrary"),
            vmem_limit_bytes=vmem_limit),
    )(x_p, prep["wmu"], prep["wsig"], prep["eps_in"], prep["bias"])

    return out[:B, :N]


# ----------------------------------------------------------------------------
# Deterministic parameter / noise construction mirroring __init__,
# reset_parametrs() and reset_noise() of the PyTorch module.
# ----------------------------------------------------------------------------
def make_noisy_linear_params(key, in_features, out_features, std_init=0.1):
    k_wmu, k_bmu, k_ein, k_eout = jax.random.split(key, 4)
    mu_range = 1.0 / math.sqrt(in_features)

    weight_mu = jax.random.uniform(
        k_wmu, (out_features, in_features),
        minval=-mu_range, maxval=mu_range, dtype=jnp.float32)
    weight_sigma = jnp.full((out_features, in_features),
                            std_init / math.sqrt(in_features), jnp.float32)
    bias_mu = jax.random.uniform(
        k_bmu, (out_features,),
        minval=-mu_range, maxval=mu_range, dtype=jnp.float32)
    bias_sigma = jnp.full((out_features,),
                          std_init / math.sqrt(out_features), jnp.float32)

    def scale_noise(k, size):
        v = jax.random.normal(k, (size,), dtype=jnp.float32)
        return jnp.sign(v) * jnp.sqrt(jnp.abs(v))

    eps_in = scale_noise(k_ein, in_features)     # factored noise
    eps_out = scale_noise(k_eout, out_features)  # factored noise
    return weight_mu, weight_sigma, eps_in, eps_out, bias_mu, bias_sigma


if __name__ == "__main__":
    key = jax.random.PRNGKey(0)

    def reference(x, wmu, wsig, eps_in, eps_out, bmu, bsig):
        # Pure-JAX mirror of F.linear with the full rank-1 weight_epsilon.
        w_eps = jnp.outer(eps_out, eps_in)       # eps_out.ger(eps_in)
        w_eff = wmu + wsig * w_eps
        b_eff = bmu + bsig * eps_out
        return x @ w_eff.T + b_eff

    # --- Case 1: RL-sized tiny layer, single-K path, f32 (bit-tight) --------
    k1, k2, key = jax.random.split(key, 3)
    B1, K1, N1 = 8, 32, 64
    x1 = jax.random.normal(k1, (B1, K1), dtype=jnp.float32)
    wmu1, wsig1, ein1, eout1, bmu1, bsig1 = make_noisy_linear_params(k2, K1, N1)
    prep1 = prepare_noisy_linear(wmu1, wsig1, bmu1, bsig1, ein1, eout1,
                                 compute_dtype=jnp.float32)
    y1 = jax.block_until_ready(noisy_linear_apply(x1, prep1))
    y1_ref = reference(x1, wmu1, wsig1, ein1, eout1, bmu1, bsig1)
    assert y1.shape == (B1, N1)
    assert jnp.allclose(y1, y1_ref, atol=1e-5, rtol=1e-5), "f32 path mismatch"

    # --- Case 2: larger layer, multi-K accumulation, default bf16 streaming -
    k3, k4 = jax.random.split(key)
    B2, K2, N2 = 16, 512, 256
    x2 = jax.random.normal(k3, (B2, K2), dtype=jnp.float32)
    wmu2, wsig2, ein2, eout2, bmu2, bsig2 = make_noisy_linear_params(k4, K2, N2)
    prep2 = prepare_noisy_linear(wmu2, wsig2, bmu2, bsig2, ein2, eout2,
                                 tn=128, tk=256)  # force a tiled (2,1,2) grid
    y2 = jax.block_until_ready(noisy_linear_apply(x2, prep2))
    y2_ref = reference(x2, wmu2, wsig2, ein2, eout2, bmu2, bsig2)
    assert y2.shape == (B2, N2)
    # bf16-streamed operands with f32 accumulation: loose tolerance vs f32 ref.
    assert jnp.allclose(y2, y2_ref, atol=5e-2, rtol=5e-2), "bf16 path mismatch"

    print("KERNEL_OK")
</pallas_src>

<mosaic_0001>
module attributes {stable_mosaic.version = 11 : i64} {
  func.func @_noisy_linear_kernel_single_k(%arg0: i32, %arg1: i32, %arg2: i32, %arg3: memref<8x128xf32, #tpu.memory_space<vmem>>, %arg4: memref<128x128xf32, #tpu.memory_space<vmem>>, %arg5: memref<128x128xf32, #tpu.memory_space<vmem>>, %arg6: memref<128x1xf32, #tpu.memory_space<vmem>>, %arg7: memref<1x128xf32, #tpu.memory_space<vmem>>, %arg8: memref<8x128xf32, #tpu.memory_space<vmem>>) attributes {dimension_semantics = [#tpu.dimension_semantics<parallel>, #tpu.dimension_semantics<parallel>, #tpu.dimension_semantics<arbitrary>], iteration_bounds = array<i64: 1, 1, 1>, scalar_prefetch = 0 : i64, scratch_operands = 0 : i64, tpu.core_type = #tpu.core_type<tc>, window_params = [{transform_indices = @transform_0, window_bounds = array<i64: 8, 128>}, {transform_indices = @transform_1, window_bounds = array<i64: 128, 128>}, {transform_indices = @transform_2, window_bounds = array<i64: 128, 128>}, {transform_indices = @transform_3, window_bounds = array<i64: 128, 1>}, {transform_indices = @transform_4, window_bounds = array<i64: 1, 128>}, {transform_indices = @transform_5, window_bounds = array<i64: 8, 128>}]} {
    %c0 = arith.constant 0 : index
    %c0_0 = arith.constant 0 : index
    %0 = vector.load %arg4[%c0, %c0_0] : memref<128x128xf32, #tpu.memory_space<vmem>>, vector<128x128xf32>
    %c0_1 = arith.constant 0 : index
    %c0_2 = arith.constant 0 : index
    %1 = vector.load %arg5[%c0_1, %c0_2] : memref<128x128xf32, #tpu.memory_space<vmem>>, vector<128x128xf32>
    %c0_3 = arith.constant 0 : index
    %c0_4 = arith.constant 0 : index
    %2 = vector.load %arg6[%c0_3, %c0_4] : memref<128x1xf32, #tpu.memory_space<vmem>>, vector<128x1xf32>
    %3 = vector.broadcast %2 : vector<128x1xf32> to vector<128x128xf32>
    %4 = arith.mulf %1, %3 : vector<128x128xf32>
    %5 = arith.addf %0, %4 : vector<128x128xf32>
    %c0_5 = arith.constant 0 : index
    %c0_6 = arith.constant 0 : index
    %6 = vector.load %arg3[%c0_5, %c0_6] : memref<8x128xf32, #tpu.memory_space<vmem>>, vector<8x128xf32>
    %cst = arith.constant dense<0.000000e+00> : vector<8x128xf32>
    %7 = tpu.matmul %6, %5, %cst {dimension_numbers = #tpu.dot_dimension_numbers<[1], [0], [0], [1], [0, 0, 1, 1], [], []>} : vector<8x128xf32>, vector<128x128xf32>, vector<8x128xf32> -> vector<8x128xf32>
    %c0_7 = arith.constant 0 : index
    %c0_8 = arith.constant 0 : index
    %8 = vector.load %arg7[%c0_7, %c0_8] : memref<1x128xf32, #tpu.memory_space<vmem>>, vector<1x128xf32>
    %9 = vector.broadcast %8 : vector<1x128xf32> to vector<8x128xf32>
    %10 = arith.addf %7, %9 : vector<8x128xf32>
    %c0_9 = arith.constant 0 : index
    %c0_10 = arith.constant 0 : index
    %11 = vector.load %arg8[%c0_9, %c0_10] : memref<8x128xf32, #tpu.memory_space<vmem>>, vector<8x128xf32>
    tpu.vector_store %arg8[%c0_9, %c0_10], %10 {strides = array<i32>} : memref<8x128xf32, #tpu.memory_space<vmem>>, vector<8x128xf32>,
    return
  }
  func.func @transform_0(%arg0: i32, %arg1: i32, %arg2: i32) -> (i32, i32) {
    %c0_i32 = arith.constant 0 : i32
    return %arg1, %arg2 : i32, i32
  }
  func.func @transform_1(%arg0: i32, %arg1: i32, %arg2: i32) -> (i32, i32) {
    %c0_i32 = arith.constant 0 : i32
    return %arg2, %arg0 : i32, i32
  }
  func.func @transform_2(%arg0: i32, %arg1: i32, %arg2: i32) -> (i32, i32) {
    %c0_i32 = arith.constant 0 : i32
    return %arg2, %arg0 : i32, i32
  }
  func.func @transform_3(%arg0: i32, %arg1: i32, %arg2: i32) -> (i32, i32) {
    %c0_i32 = arith.constant 0 : i32
    %c0_i32_0 = arith.constant 0 : i32
    return %arg2, %c0_i32 : i32, i32
  }
  func.func @transform_4(%arg0: i32, %arg1: i32, %arg2: i32) -> (i32, i32) {
    %c0_i32 = arith.constant 0 : i32
    %c0_i32_0 = arith.constant 0 : i32
    return %c0_i32, %arg0 : i32, i32
  }
  func.func @transform_5(%arg0: i32, %arg1: i32, %arg2: i32) -> (i32, i32) {
    %c0_i32 = arith.constant 0 : i32
    return %arg1, %arg0 : i32, i32
  }
}

</mosaic_0001>

<bundles_post_ra>
// kernel: tpu_custom_call.1
= control target key start
LH: loop header
LB: loop body
LE: loop exit
PB: predicated region body
PF: predicated region fallthrough
CT: control target
= control target key end

     0   :  { %10 = vsyncpa [#allocation3], 0  ;;  %s594_s0 = inlined_call_operand.hbm [shape: f32[8,128], index: 0, kind: input, shape index: {}]   ;;  %s595_s1 = inlined_call_operand.vmem [shape: f32[128,128], index: 1, kind: input, shape index: {}]   ;;  %s596_s2 = inlined_call_operand.hbm [shape: f32[128,128], index: 2, kind: input, shape index: {}]   ;;  %s597_s3 = inlined_call_operand.vmem [shape: f32[128,1], index: 3, kind: input, shape index: {}]   ;;  %s598_s4 = inlined_call_operand.vmem [shape: f32[1,128], index: 4, kind: input, shape index: {}]   ;;  %s599_s5 = inlined_call_operand.hbm [shape: f32[8,128], index: 5, kind: output, shape index: {}]  }
   0x1   :  { %11 = vsyncpa [#allocation6], 0 }
   0x2   :  { %12 = vsyncpa [#allocation4], 0  ;;  %s431_s18 = smov [#allocation2]   ;;  %s432_s20 = smov [#allocation5]  }
   0x3   :  { %s19_s19 = sshll.u32 %s431_s18, 4  ;;  %s30_s21 = sshll.u32 %s432_s20, 4  ;;  %s20_s19 = int_to_ptr.vmem [resolvable:$true] %s19_s19  ;;  %s31_s21 = int_to_ptr.vmem [resolvable:$true] %s30_s21 }
   0x4   :  { %s373_s22 = scalar_lea.vmem %s20_s19, 128  ;;  %p378_p1 = scmp.lt.s32.totalorder %s20_s19, %s20_s19 }
   0x5   :  { %p374_p0 = scmp.ne.s32.totalorder %s20_s19, %s373_s22  ;;  %p379_p2 = scmp.lt.s32.totalorder %s373_s22, %s373_s22 }
   0x7   :  { %p380_p3 = por %p379_p2, %p378_p1 }
   0x9   :  { %p381_p4 = pnand %p380_p3, %p374_p0 }
   0xb   :  { %384 = shalt.err (!%p381_p4)
}
   0xc   :  { %22 = dma.hbm_to_vmem [thread:$0]  %s594_s0, 128, %s20_s19, [#allocation3]  }
   0xd   :  { %s393_s25 = scalar_lea.vmem %s31_s21, 2048  ;;  %p398_p6 = scmp.lt.s32.totalorder %s31_s21, %s31_s21 }
   0xe   :  { %p394_p5 = scmp.ne.s32.totalorder %s31_s21, %s393_s25  ;;  %p399_p7 = scmp.lt.s32.totalorder %s393_s25, %s393_s25 }
  0x10   :  { %p400_p8 = por %p399_p7, %p398_p6 }
  0x12   :  { %p401_p9 = pnand %p400_p8, %p394_p5 }
  0x14   :  { %404 = shalt.err (!%p401_p9)
}
  0x15   :  { %s433_s26 = smov 128   ;;  %s434_s27 = smov 8  }
  0x16   :  { %36 = dma.hbm_to_vmem [thread:$0]  %s596_s2, 2048, %s31_s21, [#allocation6], %s433_s26, %s433_s26, %s434_s27  }
  0x17   :  { %425 = dma.done.wait [#allocation3], 128  }
  0x18   :  { %426 = vsyncadd [#allocation3], 4294967168 }
  0x19   :  { %427 = dma.done.wait [#allocation6], 2048  }
  0x1a   :  { %428 = vsyncadd [#allocation6], 4294965248  ;;  %v435_v0 = vmov 0   ;;  %v94_v1 = vld [vmem:[%s597_s3 + $0x78] sm:$0xff]  ;;  %v92_v2 = vld [vmem:[%s597_s3 + $0x68] sm:$0xff]  ;;  %v436_v3 = vmov 0.0  }
  0x1b   :  { %364 = vset.pattern.permute.xlu1 %v435_v0  ;;  %363 = vset.pattern.permute.xlu0 %v435_v0  ;;  %v93_v4 = vld [vmem:[%s597_s3 + $0x70] sm:$0xff]  ;;  %v91_v5 = vld [vmem:[%s597_s3 + $0x60] sm:$0xff]  ;;  %v90_v6 = vld [vmem:[%s597_s3 + $0x58] sm:$0xff]  ;;  %vm437_vm0 = vmmov 0   ;;  %s438_s13 = smov [#allocation7]  }
  0x1c   :  { %320 = vmatprep.subr.mxu0 %v436_v3  ;;  %172 = vperm.xlu0 %363, %v94_v1   ;;  %v89_v7 = vld [vmem:[%s597_s3 + $0x50] sm:$0xff]  ;;  %v88_v8 = vld [vmem:[%s597_s3 + $0x48] sm:$0xff]  ;;  %v87_v9 = vld [vmem:[%s597_s3 + $0x40] sm:$0xff]  ;;  %s292_s14 = sshll.u32 %s438_s13, 4  ;;  %s293_s14 = int_to_ptr.vmem [resolvable:$true] %s292_s14 }
  0x1d   :  { %162 = vperm.xlu1 %364, %v92_v2   ;;  %v86_v10 = vld [vmem:[%s597_s3 + $0x38] sm:$0xff]  ;;  %v85_v11 = vld [vmem:[%s597_s3 + $0x30] sm:$0xff]  ;;  %v84_v12 = vld [vmem:[%s597_s3 + $0x28] sm:$0xff]  ;;  %352 = vmatprep.mubr.msk.f32.mxu0 %vm437_vm0, %v436_v3  ;;  %p410_p11 = scmp.lt.s32.totalorder %s293_s14, %s293_s14 }
  0x1e   :  { %v83_v13 = vld [vmem:[%s597_s3 + $0x20] sm:$0xff]  ;;  %v82_v14 = vld [vmem:[%s597_s3 + $0x18] sm:$0xff]  ;;  %v81_v15 = vld [vmem:[%s597_s3 + $0x10] sm:$0xff] }
  0x1f   :  { %v80_v16 = vld [vmem:[%s597_s3 + $0x8] sm:$0xff]  ;;  %v79_v17 = vld [vmem:[%s597_s3] sm:$0xff]  ;;  %v62_v21 = vld [vmem:[%s595_s1 + $0x78] sm:$0xff] }
  0x20   :  { %167 = vperm.xlu0 %363, %v93_v4   ;;  %v78_v18 = vld [vmem:[#allocation5 + $0x78] sm:$0xff]  ;;  %v76_v23 = vld [vmem:[#allocation5 + $0x68] sm:$0xff]  ;;  %v77_v24 = vld [vmem:[#allocation5 + $0x70] sm:$0xff] }
  0x21   :  { %157 = vperm.xlu1 %364, %v91_v5   ;;  %v61_v27 = vld [vmem:[%s595_s1 + $0x70] sm:$0xff]  ;;  %v75_v29 = vld [vmem:[#allocation5 + $0x60] sm:$0xff]  ;;  %v74_v33 = vld [vmem:[#allocation5 + $0x58] sm:$0xff] }
  0x22   :  { %v60_v32 = vld [vmem:[%s595_s1 + $0x68] sm:$0xff]  ;;  %v59_v36 = vld [vmem:[%s595_s1 + $0x60] sm:$0xff]  ;;  %v73_v39 = vld [vmem:[#allocation5 + $0x50] sm:$0xff] }
  0x23   :  { %v58_v42 = vld [vmem:[%s595_s1 + $0x58] sm:$0xff]  ;;  %v72_v43 = vld [vmem:[#allocation5 + $0x48] sm:$0xff]  ;;  %v71_v49 = vld [vmem:[#allocation5 + $0x40] sm:$0xff] }
  0x24   :  { %152 = vperm.xlu0 %363, %v90_v6   ;;  %v57_v46 = vld [vmem:[%s595_s1 + $0x50] sm:$0xff]  ;;  %v56_v52 = vld [vmem:[%s595_s1 + $0x48] sm:$0xff]  ;;  %v70_v53 = vld [vmem:[#allocation5 + $0x38] sm:$0xff] }
  0x25   :  { %147 = vperm.xlu1 %364, %v89_v7   ;;  %v55_v56 = vld [vmem:[%s595_s1 + $0x40] sm:$0xff]  ;;  %v69_v59 = vld [vmem:[#allocation5 + $0x30] sm:$0xff]  ;;  %v68_v63 = vld [vmem:[#allocation5 + $0x28] sm:$0xff] }
  0x26   :  { %v54_v62 = vld [vmem:[%s595_s1 + $0x38] sm:$0xff]  ;;  %v53_v2 = vld [vmem:[%s595_s1 + $0x30] sm:$0xff]  ;;  %v67_v6 = vld [vmem:[#allocation5 + $0x20] sm:$0xff] }
  0x28   :  { %142 = vperm.xlu0 %363, %v88_v8  }
  0x29   :  { %137 = vperm.xlu1 %364, %v87_v9   ;;  %v52_v9 = vld [vmem:[%s595_s1 + $0x28] sm:$0xff] }
  0x2c   :  { %132 = vperm.xlu0 %363, %v86_v10   ;;  %v66_v10 = vld [vmem:[#allocation5 + $0x18] sm:$0xff] }
  0x2d   :  { %127 = vperm.xlu1 %364, %v85_v11  }
  0x30   :  { %122 = vperm.xlu0 %363, %v84_v12  }
  0x31   :  { %117 = vperm.xlu1 %364, %v83_v13   ;;  %v51_v13 = vld [vmem:[%s595_s1 + $0x20] sm:$0xff] }
  0x34   :  { %112 = vperm.xlu0 %363, %v82_v14  }
  0x35   :  { %107 = vperm.xlu1 %364, %v81_v15  }
  0x38   :  { %102 = vperm.xlu0 %363, %v80_v16   ;;  %v65_v16 = vld [vmem:[#allocation5 + $0x10] sm:$0xff] }
  0x39   :  { %97 = vperm.xlu1 %364, %v79_v17  }
  0x97   :  { %v173_v19 = vpop.permute.xlu0 %172 }
  0x98   :  { %v163_v20 = vpop.permute.xlu1 %162  ;;  %v190_v22 = vmul.f32 %v173_v19, %v78_v18  ;;  %v50_v19 = vld [vmem:[%s595_s1 + $0x18] sm:$0xff] }
  0x99   :  { %v188_v30 = vmul.f32 %v163_v20, %v76_v23  ;;  %v64_v20 = vld [vmem:[#allocation5 + $0x8] sm:$0xff] }
  0x9a   :  { %v206_v25 = vadd.f32 %v190_v22, %v62_v21  ;;  %v49_v23 = vld [vmem:[%s595_s1 + $0x10] sm:$0xff] }
  0x9b   :  { %v168_v26 = vpop.permute.xlu0 %167  ;;  %v204_v40 = vadd.f32 %v188_v30, %v60_v32  ;;  %v47_v32 = vld [vmem:[%s595_s1] sm:$0xff] }
  0x9c   :  { %v158_v28 = vpop.permute.xlu1 %157  ;;  %v189_v31 = vmul.f32 %v168_v26, %v77_v24  ;;  %321 = vmatpush3.msra.mxu0 %v206_v25  ;;  %v63_v26 = vld [vmem:[#allocation5] sm:$0xff] }
  0x9d   :  { %322 = vmatprep.subr.mxu0 %v436_v3  ;;  %v187_v35 = vmul.f32 %v158_v28, %v75_v29  ;;  %v48_v29 = vld [vmem:[%s595_s1 + $0x8] sm:$0xff]  ;;  %s405_s1 = scalar_lea.vmem %s293_s14, 128 }
  0x9e   :  { %v205_v34 = vadd.f32 %v189_v31, %v61_v27  ;;  %p406_p10 = scmp.ne.s32.totalorder %s293_s14, %s405_s1  ;;  %p411_p12 = scmp.lt.s32.totalorder %s405_s1, %s405_s1 }
  0x9f   :  { %v153_v37 = vpop.permute.xlu0 %152  ;;  %v203_v44 = vadd.f32 %v187_v35, %v59_v36  ;;  %v207_v35 = vld [vmem:[#allocation2] sm:$0xff] }
  0xa0   :  { %v148_v38 = vpop.permute.xlu1 %147  ;;  %v186_v41 = vmul.f32 %v153_v37, %v74_v33  ;;  %323 = vmatpush3.msra.mxu0 %v205_v34  ;;  %v302_v36 = vld [vmem:[%s598_s4] ss:$0 sm:$0xff]  ;;  %p412_p13 = por %p411_p12, %p410_p11 }
  0xa1   :  { %324 = vmatprep.subr.mxu0 %v436_v3  ;;  %v185_v45 = vmul.f32 %v148_v38, %v73_v39 }
  0xa2   :  { %325 = vmatpush3.msra.mxu0 %v204_v40  ;;  %v202_v50 = vadd.f32 %v186_v41, %v58_v42  ;;  %p413_p0 = pnand %p412_p13, %p406_p10 }
  0xa3   :  { %v143_v47 = vpop.permute.xlu0 %142  ;;  %326 = vmatprep.subr.mxu0 %v436_v3  ;;  %v201_v54 = vadd.f32 %v185_v45, %v57_v46 }
  0xa4   :  { %v138_v48 = vpop.permute.xlu1 %137  ;;  %v184_v51 = vmul.f32 %v143_v47, %v72_v43  ;;  %327 = vmatpush3.msra.mxu0 %v203_v44 }
  0xa5   :  { %328 = vmatprep.subr.mxu0 %v436_v3  ;;  %v183_v55 = vmul.f32 %v138_v48, %v71_v49 }
  0xa6   :  { %329 = vmatpush3.msra.mxu0 %v202_v50  ;;  %v200_v60 = vadd.f32 %v184_v51, %v56_v52 }
  0xa7   :  { %v133_v57 = vpop.permute.xlu0 %132  ;;  %330 = vmatprep.subr.mxu0 %v436_v3  ;;  %v199_v0 = vadd.f32 %v183_v55, %v55_v56 }
  0xa8   :  { %v128_v58 = vpop.permute.xlu1 %127  ;;  %v182_v61 = vmul.f32 %v133_v57, %v70_v53  ;;  %331 = vmatpush3.msra.mxu0 %v201_v54 }
  0xa9   :  { %332 = vmatprep.subr.mxu0 %v436_v3  ;;  %v181_v1 = vmul.f32 %v128_v58, %v69_v59 }
  0xaa   :  { %333 = vmatpush3.msra.mxu0 %v200_v60  ;;  %v198_v7 = vadd.f32 %v182_v61, %v54_v62 }
  0xab   :  { %v123_v4 = vpop.permute.xlu0 %122  ;;  %334 = vmatprep.subr.mxu0 %v436_v3  ;;  %v197_v11 = vadd.f32 %v181_v1, %v53_v2 }
  0xac   :  { %v118_v5 = vpop.permute.xlu1 %117  ;;  %v180_v8 = vmul.f32 %v123_v4, %v68_v63  ;;  %335 = vmatpush3.msra.mxu0 %v199_v0 }
  0xad   :  { %336 = vmatprep.subr.mxu0 %v436_v3  ;;  %v179_v12 = vmul.f32 %v118_v5, %v67_v6 }
  0xae   :  { %337 = vmatpush3.msra.mxu0 %v198_v7  ;;  %v196_v17 = vadd.f32 %v180_v8, %v52_v9 }
  0xaf   :  { %v113_v14 = vpop.permute.xlu0 %112  ;;  %338 = vmatprep.subr.mxu0 %v436_v3  ;;  %v195_v21 = vadd.f32 %v179_v12, %v51_v13 }
  0xb0   :  { %v108_v15 = vpop.permute.xlu1 %107  ;;  %v178_v18 = vmul.f32 %v113_v14, %v66_v10  ;;  %339 = vmatpush3.msra.mxu0 %v197_v11 }
  0xb1   :  { %340 = vmatprep.subr.mxu0 %v436_v3  ;;  %v177_v22 = vmul.f32 %v108_v15, %v65_v16 }
  0xb2   :  { %341 = vmatpush3.msra.mxu0 %v196_v17  ;;  %v194_v27 = vadd.f32 %v178_v18, %v50_v19 }
  0xb3   :  { %v103_v24 = vpop.permute.xlu0 %102  ;;  %342 = vmatprep.subr.mxu0 %v436_v3  ;;  %v193_v30 = vadd.f32 %v177_v22, %v49_v23 }
  0xb4   :  { %v98_v25 = vpop.permute.xlu1 %97  ;;  %v176_v28 = vmul.f32 %v103_v24, %v64_v20  ;;  %343 = vmatpush3.msra.mxu0 %v195_v21 }
  0xb5   :  { %344 = vmatprep.subr.mxu0 %v436_v3  ;;  %v175_v31 = vmul.f32 %v98_v25, %v63_v26 }
  0xb6   :  { %345 = vmatpush3.msra.mxu0 %v194_v27  ;;  %v192_v33 = vadd.f32 %v176_v28, %v48_v29 }
  0xb7   :  { %346 = vmatprep.subr.mxu0 %v436_v3  ;;  %v191_v34 = vadd.f32 %v175_v31, %v47_v32 }
  0xb8   :  { %347 = vmatpush3.msra.mxu0 %v193_v30 }
  0xb9   :  { %348 = vmatprep.subr.mxu0 %v436_v3 }
  0xba   :  { %349 = vmatpush3.msra.mxu0 %v192_v33 }
  0xbb   :  { %350 = vmatprep.subr.mxu0 %v436_v3 }
  0xbc   :  { %351 = vmatpush3.msra.mxu0 %v191_v34 }
  0xbd   :  { %353 = vmatmul.mubr.f32.vlgmr.msra.gmra.mxu0 %v207_v35 }
 0x17d   :  { %v281_v37 = vpop.f32.mrf.mxu0 }
 0x17e   :  { %v282_v38 = vadd.f32 %v302_v36, %v281_v37 }
 0x17f   :  { %v354_v39 = vpop.f32.mrf.mxu0 }
 0x180   :  { %285 = vst [vmem:[#allocation7] sm:$0xff] %v282_v38 }
 0x181   :  { %416 = shalt.err (!%p413_p0)
}
 0x182   :  { %295 = dma.vmem_to_hbm [thread:$0]  %s293_s14, 128, %s599_s5, [#allocation4]  }
 0x183   :  { %429 = dma.done.wait [#allocation4], 128  }
 0x184   :  { %430 = vsyncadd [#allocation4], 4294967168 }
 0x185   :  { %299 = vsyncpa [#allocation3], 1 }
 0x186   :  { %300 = vsyncpa [#allocation6], 1 }
 0x187   :  { %301 = vsyncpa [#allocation4], 1 }

</bundles_post_ra>
